<compile_context>
chip_gen: v6e
topology: v6e:2x2x1
jax: 0.10.0
libtpu: 0.0.40
codegen_flags: <defaults>
</compile_context>

<pallas_src>
import functools

import jax
import jax.numpy as jnp
from jax.experimental import pallas as pl
from jax.experimental.pallas import tpu as pltpu


def _layernorm_kernel(x_ref, g_ref, b_ref, o_ref, *, eps):
    # x_ref: (ROW_TILE, H) block; g_ref / b_ref: (1, H).
    x = x_ref[...].astype(jnp.float32)
    # Fused single-pass moments: one reduce pass instead of two.
    mean = jnp.mean(x, axis=-1, keepdims=True)
    mean_sq = jnp.mean(x * x, axis=-1, keepdims=True)
    var = jnp.maximum(mean_sq - mean * mean, 0.0)
    inv = jax.lax.rsqrt(var + eps)
    gamma = g_ref[...].astype(jnp.float32)
    beta = b_ref[...].astype(jnp.float32)
    o_ref[...] = ((x - mean) * inv * gamma + beta).astype(o_ref.dtype)


def _round_up(x, m):
    return ((x + m - 1) // m) * m


def _vmem_capacity_bytes():
    """Per-core VMEM capacity; conservative fallback (v7x = 64 MiB per TC)."""
    try:
        return int(pltpu.get_tpu_info().vmem_capacity_bytes)
    except Exception:  # pragma: no cover - info query unavailable
        return 64 * 1024 * 1024


# Streaming-kernel roofline plateaus at ~1-4 MiB blocks; bigger buys nothing.
_BLOCK_BYTES_CAP = 2 << 20
# Keep at least this many grid blocks when rows permit (v7x megacore split).
_MIN_GRID_BLOCKS = 4


def _pick_row_tile(rows, hidden, itemsize):
    """Byte-capped row tile, keeping >= ~4 grid blocks when rows permit."""
    align = max(8, 32 // itemsize)  # sublane alignment: f32->8, bf16->16, fp8->32
    tile = _BLOCK_BYTES_CAP // max(hidden * itemsize, 1)
    tile = min(tile, pl.cdiv(rows, _MIN_GRID_BLOCKS))
    tile = max(align, (tile // align) * align)
    tile = min(tile, _round_up(rows, align))
    return int(tile)


def layernorm_pallas(x2d, gamma, beta, eps):
    """x2d: (R, H); gamma/beta: (H,) -> (R, H) LayerNorm over the last dim."""
    R, H = x2d.shape
    itemsize = jnp.dtype(x2d.dtype).itemsize
    row_tile = _pick_row_tile(R, H, itemsize)
    grid = (pl.cdiv(R, row_tile),)  # ragged last block handled by Pallas masking

    g2 = gamma.reshape(1, H)
    b2 = beta.reshape(1, H)

    kernel = functools.partial(_layernorm_kernel, eps=float(eps))

    # VMEM budget: double-buffered native in/out blocks + f32 upcast
    # intermediates (x, centered/scaled slabs) + params + slack.
    block_bytes = row_tile * H * itemsize
    f32_block_bytes = row_tile * H * 4
    vmem_needed = 4 * block_bytes + 3 * f32_block_bytes + 4 * H * 8 + (2 << 20)
    cap = _vmem_capacity_bytes()
    vmem_limit = int(min(int(0.75 * cap), max(vmem_needed, 24 << 20)))

    cost = pl.CostEstimate(
        flops=8 * R * H,
        transcendentals=R,
        bytes_accessed=2 * R * H * itemsize + 2 * H * itemsize,
    )

    out = pl.pallas_call(
        kernel,
        out_shape=jax.ShapeDtypeStruct((R, H), x2d.dtype),
        grid_spec=pltpu.PrefetchScalarGridSpec(
            num_scalar_prefetch=0,
            grid=grid,
            in_specs=[
                pl.BlockSpec((row_tile, H), lambda i: (i, 0)),
                pl.BlockSpec((1, H), lambda i: (0, 0)),
                pl.BlockSpec((1, H), lambda i: (0, 0)),
            ],
            out_specs=pl.BlockSpec((row_tile, H), lambda i: (i, 0)),
        ),
        compiler_params=pltpu.CompilerParams(
            dimension_semantics=("parallel",),
            vmem_limit_bytes=vmem_limit,
        ),
        cost_estimate=cost,
    )(x2d, g2, b2)
    return out


def _layernorm_ref(x, gamma, beta, eps):
    mean = jnp.mean(x, axis=-1, keepdims=True)
    var = jnp.mean((x - mean) ** 2, axis=-1, keepdims=True)
    return (x - mean) * jax.lax.rsqrt(var + eps) * gamma + beta


def norm_pipe_forward(args, gamma, beta, eps, *, force_pallas=False):
    """NormPipe.forward: apply LayerNorm to a single (seq, batch, hidden) tensor."""
    assert not isinstance(args, tuple), (
        "NormPipe should only receive a single tensor as input"
    )
    seq, batch, hidden = args.shape
    rows = seq * batch
    total_bytes = rows * hidden * jnp.dtype(args.dtype).itemsize
    # Small tensors (launch/DMA setup dominates) or narrow hidden (<128 lanes,
    # masked stores + underutilized reduce): XLA's fused layernorm wins.
    if not force_pallas and (total_bytes < (1 << 20) or hidden < 128):
        return _layernorm_ref(args, gamma, beta, eps)
    x2d = args.reshape(rows, hidden)
    y2d = layernorm_pallas(x2d, gamma, beta, eps)
    return y2d.reshape(seq, batch, hidden)


if __name__ == "__main__":
    eps = 1e-5
    key = jax.random.PRNGKey(0)
    kx, kg, kb, kx2 = jax.random.split(key, 4)

    # Small shapes consistent with the module: seq=8, batch=2, hidden=32.
    seq, batch, hidden = 8, 2, 32
    x = jax.random.normal(kx, (seq, batch, hidden), dtype=jnp.float32)
    # torch LayerNorm default is weight=1, bias=0; perturb to exercise the math.
    gamma = 1.0 + 0.1 * jax.random.normal(kg, (hidden,), dtype=jnp.float32)
    beta = 0.1 * jax.random.normal(kb, (hidden,), dtype=jnp.float32)

    out = norm_pipe_forward(x, gamma, beta, eps, force_pallas=True)
    out = jax.block_until_ready(out)
    ref = _layernorm_ref(x, gamma, beta, eps)
    assert jnp.allclose(out, ref, atol=1e-5, rtol=1e-5), "mismatch vs reference"

    # Second check: lane-dense hidden and rows NOT a multiple of the row tile
    # (exercises the no-pad ragged-last-block masking path).
    seq2, batch2, hidden2 = 5, 3, 256
    x2 = jax.random.normal(kx2, (seq2, batch2, hidden2), dtype=jnp.float32)
    g2 = jnp.ones((hidden2,), dtype=jnp.float32)
    b2 = jnp.zeros((hidden2,), dtype=jnp.float32)
    out2 = norm_pipe_forward(x2, g2, b2, eps, force_pallas=True)
    out2 = jax.block_until_ready(out2)
    ref2 = _layernorm_ref(x2, g2, b2, eps)
    assert jnp.allclose(out2, ref2, atol=1e-5, rtol=1e-5), "mismatch (ragged path)"

    print("KERNEL_OK")
</pallas_src>

<mosaic_0001>
module attributes {stable_mosaic.version = 11 : i64} {
  func.func @_layernorm_kernel(%arg0: i32, %arg1: memref<8x32xf32, #tpu.memory_space<vmem>>, %arg2: memref<1x32xf32, #tpu.memory_space<vmem>>, %arg3: memref<1x32xf32, #tpu.memory_space<vmem>>, %arg4: memref<8x32xf32, #tpu.memory_space<vmem>>) attributes {dimension_semantics = [#tpu.dimension_semantics<parallel>], iteration_bounds = array<i64: 2>, scalar_prefetch = 0 : i64, scratch_operands = 0 : i64, tpu.core_type = #tpu.core_type<tc>, window_params = [{transform_indices = @transform_0, window_bounds = array<i64: 8, 32>}, {pipeline_mode = #tpu.pipeline_mode<synchronous>, transform_indices = @transform_1, window_bounds = array<i64: 1, 32>}, {pipeline_mode = #tpu.pipeline_mode<synchronous>, transform_indices = @transform_2, window_bounds = array<i64: 1, 32>}, {transform_indices = @transform_3, window_bounds = array<i64: 8, 32>}]} {
    %c0 = arith.constant 0 : index
    %c0_0 = arith.constant 0 : index
    %0 = vector.load %arg1[%c0, %c0_0] : memref<8x32xf32, #tpu.memory_space<vmem>>, vector<8x32xf32>
    %cst = arith.constant dense<0.000000e+00> : vector<8xf32>
    %1 = vector.multi_reduction <add>, %0, %cst [1] : vector<8x32xf32> to vector<8xf32>
    %2 = vector.shape_cast %1 : vector<8xf32> to vector<8x1xf32>
    %cst_1 = arith.constant 3.200000e+01 : f32
    %3 = vector.broadcast %cst_1 : f32 to vector<8x1xf32>
    %4 = arith.divf %2, %3 : vector<8x1xf32>
    %5 = arith.mulf %0, %0 : vector<8x32xf32>
    %cst_2 = arith.constant dense<0.000000e+00> : vector<8xf32>
    %6 = vector.multi_reduction <add>, %5, %cst_2 [1] : vector<8x32xf32> to vector<8xf32>
    %7 = vector.shape_cast %6 : vector<8xf32> to vector<8x1xf32>
    %cst_3 = arith.constant 3.200000e+01 : f32
    %8 = vector.broadcast %cst_3 : f32 to vector<8x1xf32>
    %9 = arith.divf %7, %8 : vector<8x1xf32>
    %10 = arith.mulf %4, %4 : vector<8x1xf32>
    %11 = arith.subf %9, %10 : vector<8x1xf32>
    %cst_4 = arith.constant 0.000000e+00 : f32
    %12 = vector.broadcast %cst_4 : f32 to vector<8x1xf32>
    %13 = arith.maximumf %11, %12 : vector<8x1xf32>
    %cst_5 = arith.constant 9.99999974E-6 : f32
    %14 = vector.broadcast %cst_5 : f32 to vector<8x1xf32>
    %15 = arith.addf %13, %14 : vector<8x1xf32>
    %16 = math.rsqrt %15 : vector<8x1xf32>
    %c0_6 = arith.constant 0 : index
    %c0_7 = arith.constant 0 : index
    %17 = vector.load %arg2[%c0_6, %c0_7] : memref<1x32xf32, #tpu.memory_space<vmem>>, vector<1x32xf32>
    %c0_8 = arith.constant 0 : index
    %c0_9 = arith.constant 0 : index
    %18 = vector.load %arg3[%c0_8, %c0_9] : memref<1x32xf32, #tpu.memory_space<vmem>>, vector<1x32xf32>
    %19 = vector.broadcast %4 : vector<8x1xf32> to vector<8x32xf32>
    %20 = arith.subf %0, %19 : vector<8x32xf32>
    %21 = vector.broadcast %16 : vector<8x1xf32> to vector<8x32xf32>
    %22 = arith.mulf %20, %21 : vector<8x32xf32>
    %23 = vector.broadcast %17 : vector<1x32xf32> to vector<8x32xf32>
    %24 = arith.mulf %22, %23 : vector<8x32xf32>
    %25 = vector.broadcast %18 : vector<1x32xf32> to vector<8x32xf32>
    %26 = arith.addf %24, %25 : vector<8x32xf32>
    %c0_10 = arith.constant 0 : index
    %c0_11 = arith.constant 0 : index
    %27 = vector.load %arg4[%c0_10, %c0_11] : memref<8x32xf32, #tpu.memory_space<vmem>>, vector<8x32xf32>
    tpu.vector_store %arg4[%c0_10, %c0_11], %26 {strides = array<i32>} : memref<8x32xf32, #tpu.memory_space<vmem>>, vector<8x32xf32>,
    return
  }
  func.func @transform_0(%arg0: i32) -> (i32, i32) {
    %c0_i32 = arith.constant 0 : i32
    %c0_i32_0 = arith.constant 0 : i32
    return %arg0, %c0_i32 : i32, i32
  }
  func.func @transform_1(%arg0: i32) -> (i32, i32) {
    %c0_i32 = arith.constant 0 : i32
    %c0_i32_0 = arith.constant 0 : i32
    %c0_i32_1 = arith.constant 0 : i32
    return %c0_i32, %c0_i32_0 : i32, i32
  }
  func.func @transform_2(%arg0: i32) -> (i32, i32) {
    %c0_i32 = arith.constant 0 : i32
    %c0_i32_0 = arith.constant 0 : i32
    %c0_i32_1 = arith.constant 0 : i32
    return %c0_i32, %c0_i32_0 : i32, i32
  }
  func.func @transform_3(%arg0: i32) -> (i32, i32) {
    %c0_i32 = arith.constant 0 : i32
    %c0_i32_0 = arith.constant 0 : i32
    return %arg0, %c0_i32 : i32, i32
  }
}

</mosaic_0001>

<bundles_post_ra>
// kernel: tpu_custom_call.1
= control target key start
LH: loop header
LB: loop body
LE: loop exit
PB: predicated region body
PF: predicated region fallthrough
CT: control target
= control target key end

     0   :  { %8 = vsyncpa [#allocation3], 0  ;;  %s634_s0 = inlined_call_operand.hbm [shape: f32[16,32], index: 0, kind: input, shape index: {}]   ;;  %s635_s1 = inlined_call_operand.vmem [shape: f32[1,32], index: 1, kind: input, shape index: {}]   ;;  %s636_s2 = inlined_call_operand.vmem [shape: f32[1,32], index: 2, kind: input, shape index: {}]   ;;  %s637_s3 = inlined_call_operand.hbm [shape: f32[16,32], index: 3, kind: output, shape index: {}]  }
   0x1   :  { %10 = vsyncpa [#allocation3 + $0x1], 0 }
   0x2   :  { %11 = vsyncpa [#allocation4], 0 }
   0x3   :  { %13 = vsyncpa [#allocation4 + $0x1], 0  ;;  %s484_s12 = smov 0   ;;  %s486_s13 = smov 0  }
   0x4   :  { %s488_s14 = smov 0   ;;  %s490_s15 = smov 0  }
   0x5 LB: > { %s505_s16 = sadd.s32 4294967295, %s460_s15   ;;  %s306_s17 = sadd.s32 4294967294, %s460_s15   ;;  %s460_s15 = sphi %s490_s15, %s654_s15   ;;  %s456_s14 = sphi %s488_s14, %s653_s14   ;;  %s452_s13 = sphi %s486_s13, %s652_s13   ;;  %s448_s12 = sphi %s484_s12, %s651_s12  }
   0x6   : > { %s509_s18 = sadd.s32 1, %s460_s15   ;;  %s26_s19 = sadd.s32 1, %s456_s14 }
   0x7   : > { %s23_s20 = ssub.s32 %s460_s15, %s509_s18  ;;  %p33_p0 = scmp.ne.s32.totalorder %s456_s14, %s452_s13 }
   0x8   : > { %p24_p1 = scmp.eq.s32.totalorder %s23_s20, 0  ;;  %p34_p2 = scmp.eq.s32.totalorder %s460_s15, 0 }
   0x9   : > { %p39_p3 = scmp.ne.s32.totalorder %s452_s13, %s448_s12  ;;  %p40_p4 = scmp.eq.s32.totalorder %s505_s16, 0 }
   0xa   : > { %s521_s21 = scalar_select %p24_p1, %s456_s14, %s26_s19  }
   0xb   : > { %p523_p5 = por %p34_p2, %p33_p0  ;;  %p527_p6 = por %p40_p4, %p39_p3 }
   0xc   : > { %p105_p7 = scmp.eq.s32.totalorder %s505_s16, 1  ;;  %p111_p8 = scmp.eq.s32.totalorder %s306_s17, 1 }
   0xd   : > { %s641_s23 = scalar_select %p527_p6, 1, 0 }
   0xe   : > { %p332_p10 = scmp.lt.s32.totalorder %s460_s15, 2  ;;  %p534_p11 = por %p105_p7, %p33_p0 }
   0xf   : > { %p538_p12 = por %p111_p8, %p39_p3  ;;  %s137_s26 = sand.u32 1, %s456_s14  }
  0x10   : > { %s642_s24 = scalar_select %p534_p11, 1, 0 }
  0x11   : > { %s643_s25 = scalar_select %p538_p12, 1, 0 }
  0x12   : > { %s310_s27 = sshll.u32 %s460_s15, 7  ;;  %s309_s28 = sshll.u32 %s137_s26, 3 }
  0x13   : > { %s547_s4 = scalar_lea.hbm %s634_s0, %s310_s27  ;;  %s141_s5 = scalar_lea.vmem [#allocation2], %s309_s28 }
  0x14   : > { %s148_s6 = sshll.u32 %s141_s5, 4  ;;  %p551_p13 = pnand %p332_p10, %p523_p5  ;;  %s555_s6 = int_to_ptr.vmem [resolvable:$true] %s148_s6 }
  0x15   : > { %s138_s8 = scalar_lea.sflag [#allocation3], %s137_s26  ;;  %s368_s9 = scalar_lea.hbm %s547_s4, 128 }
  0x16   : > { %p369_p2 = scmp.ne.s32.totalorder %s547_s4, %s368_s9  ;;  %p370_p3 = pneg %p551_p13 }
  0x17   : > { %s373_s17 = scalar_lea.hbm %s634_s0, 256  ;;  %p374_p5 = scmp.lt.s32.totalorder %s547_s4, %s634_s0 }
  0x18   : > { %p371_p4 = pnand %p370_p3, %p369_p2  ;;  %p375_p8 = scmp.lt.s32.totalorder %s373_s17, %s368_s9 }
  0x1a   : > { %p372_p7 = pneg %p371_p4  ;;  %p376_p10 = por %p375_p8, %p374_p5 }
  0x1c   : > { %p377_p9 = pnand %p376_p10, %p372_p7 }
  0x1e   : > { %380 = shalt.err (!%p377_p9)
}
  0x1f   : > { %s381_s22 = scalar_lea.vmem %s555_s6, 128  ;;  %s462_s26 = smov [#allocation2]  }
  0x20   : > { %p382_p0 = scmp.ne.s32.totalorder %s555_s6, %s381_s22  ;;  %s386_s27 = sshll.u32 %s462_s26, 4  ;;  %s387_s27 = int_to_ptr.vmem [resolvable:$false] %s386_s27 }
  0x21   : > { %s388_s28 = scalar_lea.vmem %s387_s27, 256  ;;  %p389_p4 = scmp.lt.s32.totalorder %s555_s6, %s387_s27 }
  0x22   : > { %p384_p1 = pnand %p382_p0, %p370_p3  ;;  %p390_p12 = scmp.lt.s32.totalorder %s388_s28, %s381_s22 }
  0x24   : > { %p385_p2 = pneg %p384_p1  ;;  %p391_p11 = por %p390_p12, %p389_p4 }
  0x26   : > { %p392_p6 = pnand %p391_p11, %p385_p2 }
  0x28   : > { %395 = shalt.err (!%p392_p6)
}
  0x29   : > { %327 = dma.hbm_to_vmem [thread:$0]  (!%p551_p13), %s547_s4, 128, %s555_s6, %s138_s8  }
  0x2a   : > { %p645_p9 = scmp.lt.s32.totalorder %s460_s15, 3  ;;  %p646_p7 = scmp.ge.s32.totalorder %s460_s15, 1 }
  0x2c   : > { %p154_p0 = pnand %p646_p7, %p645_p9 }
  0x2d   : > { %s582_s29 = sand.u32 (!%p154_p0), 1, %s452_s13   ;;  %p647_p6 = scmp.ne.s32.totalorder (!%p154_p0), %s641_s23, 0 }
  0x2e   : > { %157 = sbr.rel (%p154_p0) target bundleno = 237 (0xed), region = 32  ;;  %s312_s30 = sshll.u32 (!%p154_p0), %s582_s29, 3 }
  0x2f   : > { %s160_s5 = scalar_lea.sflag (!%p154_p0), [#allocation3], %s582_s29  ;;  %s163_s9 = scalar_lea.vmem (!%p154_p0), [#allocation2], %s312_s30 }
  0x33   : > { %439 = dma.done.wait (%p647_p6), %s160_s5, 128  }
  0x34   : > { %441 = vsyncadd (%p647_p6), %s160_s5, 4294967168  ;;  %vm187_vm0 = vcmask 261120   ;;  %v186_v0 = vld [vmem:[%s163_s9] sm:$0xff]  ;;  %s317_s8 = sshll.u32 %s505_s16, 7  ;;  %s185_s10 = scalar_lea.vmem [#allocation5], %s312_s30 }
  0x35   : > { %v188_v1 = vsel %vm187_vm0, %v186_v0, 0.0  ;;  %v193_v2 = vmul.f32 %v186_v0, %v186_v0  ;;  %v314_v14 = vld [vmem:[%s635_s1] ss:$0 sm:$0xff]  ;;  %s236_s11 = sshll.u32 %s185_s10, 4  ;;  %s234_s20 = scalar_lea.hbm %s637_s3, %s317_s8  ;;  %s237_s11 = int_to_ptr.vmem [resolvable:$true] %s236_s11 }
  0x36   : > { %189 = vadd.xlane.f32.xlu0 %v188_v1  ;;  %v315_v16 = vld [vmem:[%s636_s2] ss:$0 sm:$0xff]  ;;  %s223_s22 = scalar_lea.sflag [#allocation4], %s582_s29  ;;  %s396_s26 = scalar_lea.vmem %s237_s11, 128 }
  0x37   : > { %v194_v3 = vsel %vm187_vm0, %v193_v2, 0.0  ;;  %p397_p11 = scmp.ne.s32.totalorder %s237_s11, %s396_s26  ;;  %p648_p12 = scmp.ne.s32.totalorder %s642_s24, 0 }
  0x38   : > { %s463_s27 = smov [#allocation5]  }
  0x39   : > { %p398_p13 = pnand %p397_p11, %p648_p12  ;;  %s400_s28 = sshll.u32 %s463_s27, 4  ;;  %s401_s28 = int_to_ptr.vmem [resolvable:$false] %s400_s28 }
  0x3a   : > { %195 = vadd.xlane.f32.xlu0 %v194_v3  ;;  %s402_s16 = scalar_lea.vmem %s401_s28, 256  ;;  %p403_p3 = scmp.lt.s32.totalorder %s237_s11, %s401_s28 }
  0x3b   : > { %p399_p1 = pneg %p398_p13  ;;  %p404_p5 = scmp.lt.s32.totalorder %s402_s16, %s396_s26 }
  0x3d   : > { %p405_p8 = por %p404_p5, %p403_p3 }
  0x3f   : > { %p406_p10 = pnand %p405_p8, %p399_p1 }
  0xbf   : > { %v190_v4 = vpop.xlane.xlu0 %189 }
  0xc0   : > { %v192_v5 = vmul.f32 0.03125, %v190_v4 }
  0xc2   : > { %v198_v7 = vmul.f32 %v192_v5, %v192_v5  ;;  %v205_v12 = vsub.f32 %v186_v0, %v192_v5 }
  0xc3   : > { %v196_v6 = vpop.xlane.xlu0 %195 }
  0xc4   : > { %v197_v8 = vmul.f32 0.03125, %v196_v6 }
  0xc6   : > { %v199_v9 = vsub.f32 %v197_v8, %v198_v7 }
  0xc8   : > { %v200_v10 = vmax.f32 %v199_v9, 0.0 }
  0xca   : > { %v201_v11 = vadd.f32 1e-05, %v200_v10 }
  0xcc   : > { %366 = vrsqrt.f32 %v201_v11 }
  0xd9   : > { %v367_v13 = vpop.eup %366 }
  0xda   : > { %v206_v15 = vmul.f32 %v367_v13, %v205_v12 }
  0xdc   : > { %v213_v17 = vmul.f32 %v314_v14, %v206_v15 }
  0xde   : > { %v220_v18 = vadd.f32 %v315_v16, %v213_v17 }
  0xe0   : > { %221 = vst.msk [vmem:[%s185_s10] sm:$0xff] %vm187_vm0, %v220_v18 }
  0xe1   : > { %409 = shalt.err (!%p406_p10)
}
  0xe2   : > { %s410_s30 = scalar_lea.hbm %s234_s20, 128  ;;  %s414_s9 = scalar_lea.hbm %s637_s3, 256 }
  0xe3   : > { %p411_p2 = scmp.ne.s32.totalorder %s234_s20, %s410_s30  ;;  %p415_p7 = scmp.lt.s32.totalorder %s234_s20, %s637_s3 }
  0xe4   : > { %p416_p0 = scmp.lt.s32.totalorder %s414_s9, %s410_s30 }
  0xe5   : > { %p412_p4 = pnand %p411_p2, %p648_p12 }
  0xe6   : > { %p417_p6 = por %p416_p0, %p415_p7 }
  0xe7   : > { %p413_p9 = pneg %p412_p4 }
  0xe9   : > { %p418_p11 = pnand %p417_p6, %p413_p9 }
  0xeb   : > { %421 = shalt.err (!%p418_p11)
}
  0xec   : > { %322 = dma.vmem_to_hbm [thread:$0]  (%p648_p12), %s237_s11, 128, %s234_s20, %s223_s22  }
  0xed PF: > { %s248_s6 = sand.u32 1, %s448_s12   ;;  %p649_p13 = scmp.ne.s32.totalorder %s643_s25, 0 }
  0xee   : > { %p650_p1 = scmp.ge.s32.totalorder %s460_s15, 2  ;;  %s249_s7 = scalar_lea.sflag [#allocation4], %s248_s6 }
  0xf0   : > { %p329_p3 = pnand %p650_p1, %p649_p13 }
  0xf2   : > { %p330_p5 = pneg %p329_p3 }
  0xf4   : > { %443 = dma.done.wait (%p330_p5), %s249_s7, 128  }
  0xf5   : > { %445 = vsyncadd (%p330_p5), %s249_s7, 4294967168  ;;  %p16_p8 = scmp.ge.s32.totalorder %s509_s18, 4   ;;  %s651_s12 = smov %s452_s13 }
  0xf6   : > { %s652_s13 = smov %s456_s14  ;;  %s653_s14 = smov %s521_s21 }
  0xf7   : > { %s654_s15 = smov %s509_s18  ;;  %18 = sbr.rel (!%p16_p8) target bundleno = 5 (0x5), region = 77 }
  0xfc   :  { %254 = vsyncpa [#allocation3], 1 }
  0xfd   :  { %256 = vsyncpa [#allocation3 + $0x1], 1 }
  0xfe   :  { %257 = vsyncpa [#allocation4], 1 }
  0xff   :  { %259 = vsyncpa [#allocation4 + $0x1], 1 }

</bundles_post_ra>
